<compile_context>
chip_gen: v5e
topology: v5e:2x2
jax: 0.10.0
libtpu: 0.0.40
codegen_flags: <defaults>
</compile_context>

<pallas_src>
import functools

import jax
import jax.numpy as jnp
from jax.experimental import pallas as pl
from jax.experimental.pallas import tpu as pltpu


def conv_bn_relu_kernel(x_ref, w_ref, gamma_ref, beta_ref, o_ref, *,
                        N, L, L_out, K, eps):
    # x_ref:     (C_in, Lpad)     flattened lane-dense input, column p = n*L + l
    # w_ref:     (C_out, K*C_in)  row index r = k*C_in + c
    # gamma_ref: (C_out, 1)
    # beta_ref:  (C_out, 1)
    # o_ref:     (C_out, Lpad)
    C_in, Lpad = x_ref.shape

    x = x_ref[...]  # (C_in, Lpad) f32

    # ---- im2col via lane rotations (XLU slot, overlaps with MXU/VPU work):
    # rhs[k*C_in + c, p] = x[c, (p + k) mod Lpad]  (== x[n, c, l + k] on valid p)
    rows = [x]
    for k in range(1, K):
        # shift = Lpad - k  ==  jnp.roll(x, -k, axis=1): left-shift by k lanes.
        rows.append(pltpu.roll(x, shift=Lpad - k, axis=1))
    rhs = jnp.concatenate(rows, axis=0)  # (K*C_in, Lpad)

    # ---- Conv1d (bias=False) as a single MXU matmul, contraction = C_in*K.
    y = jnp.dot(w_ref[...], rhs, preferred_element_type=jnp.float32)  # (C_out, Lpad)

    # Valid output columns: p = n*L + l with n < N and l < L_out (the rest are
    # batch-boundary / pad garbage; the wrapper slices them off).
    col = jax.lax.broadcasted_iota(jnp.int32, (1, Lpad), 1)
    valid = (col < N * L) & ((col % L) < L_out)

    # ---- BatchNorm1d training-mode stats (biased var), ONE pass over y.
    # (E[y^2] - mean^2 is slightly less stable than centered two-pass; f32
    #  accumulators + clamp at 0 keep it safe for these magnitudes.)
    yv = jnp.where(valid, y, 0.0)
    inv_n = 1.0 / float(N * L_out)
    mean = jnp.sum(yv, axis=1, keepdims=True) * inv_n                  # (C_out, 1)
    var = jnp.sum(yv * yv, axis=1, keepdims=True) * inv_n - mean * mean
    var = jnp.maximum(var, 0.0)

    # Fold gamma/beta with the stats into one scale/shift per channel.
    scale = gamma_ref[...] * jax.lax.rsqrt(var + eps)                  # EUP rsqrt, f32
    shift = beta_ref[...] - mean * scale

    # ---- normalize + ReLU; full-lane (unmasked) store.
    o_ref[...] = jnp.maximum(y * scale + shift, 0.0)


def basic_conv1d(x, w, gamma, beta, *, eps=1e-3):
    """x: (N, C_in, L), w: (C_out, C_in, K), gamma/beta: (C_out,).
    Returns (N, C_out, L_out) float32 with L_out = L - K + 1 (stride 1, no pad)."""
    N, C_in, L = x.shape
    C_out, _, K = w.shape
    L_out = L - K + 1
    NL = N * L
    Lpad = pl.cdiv(NL, 128) * 128  # lane-dense width (multiple of 128)

    # Layout plumbing only (no compute): lane-dense (C_in, N*L) slab, zero-padded.
    x_flat = jnp.transpose(x.astype(jnp.float32), (1, 0, 2)).reshape(C_in, NL)
    x_flat = jnp.pad(x_flat, ((0, 0), (0, Lpad - NL)))

    # Weight rows ordered k-major to match the concat([roll_k(x)]) RHS rows.
    w2 = jnp.transpose(w.astype(jnp.float32), (0, 2, 1)).reshape(C_out, K * C_in)

    gamma2 = gamma.astype(jnp.float32).reshape(C_out, 1)
    beta2 = beta.astype(jnp.float32).reshape(C_out, 1)

    kernel = functools.partial(conv_bn_relu_kernel,
                               N=N, L=L, L_out=L_out, K=K, eps=eps)

    y = pl.pallas_call(
        kernel,
        out_shape=jax.ShapeDtypeStruct((C_out, Lpad), jnp.float32),
        in_specs=[
            pl.BlockSpec((C_in, Lpad), lambda: (0, 0)),
            pl.BlockSpec((C_out, K * C_in), lambda: (0, 0)),
            pl.BlockSpec((C_out, 1), lambda: (0, 0)),
            pl.BlockSpec((C_out, 1), lambda: (0, 0)),
        ],
        out_specs=pl.BlockSpec((C_out, Lpad), lambda: (0, 0)),
    )(x_flat, w2, gamma2, beta2)

    # Slice the valid columns back out: column p = n*L + l, keep l < L_out.
    out = y[:, :NL].reshape(C_out, N, L)[:, :, :L_out]
    return jnp.transpose(out, (1, 0, 2))  # (N, C_out, L_out)


def _reference(x, w, gamma, beta, *, eps=1e-3):
    """Pure-JAX reference (conv -> training-mode BN -> ReLU), f32."""
    N, C_in, L = x.shape
    C_out, _, K = w.shape
    L_out = L - K + 1
    x = x.astype(jnp.float32)
    w = w.astype(jnp.float32)
    y = jnp.zeros((N, C_out, L_out), jnp.float32)
    for k in range(K):
        y = y + jnp.einsum("oi,nil->nol", w[:, :, k], x[:, :, k:k + L_out],
                           precision=jax.lax.Precision.HIGHEST)
    mean = jnp.mean(y, axis=(0, 2), keepdims=True)
    var = jnp.mean((y - mean) ** 2, axis=(0, 2), keepdims=True)
    y = (y - mean) * jax.lax.rsqrt(var + eps)
    y = y * gamma.reshape(1, C_out, 1) + beta.reshape(1, C_out, 1)
    return jnp.maximum(y, 0.0)


if __name__ == "__main__":
    # Small shapes consistent with Conv1d: batch=2, in_channels=4,
    # out_channels=8, length=16, kernel_size=3.
    N, C_in, C_out, L, K = 2, 4, 8, 16, 3

    key = jax.random.PRNGKey(0)
    kx, kw, kg, kb = jax.random.split(key, 4)

    x = jax.random.normal(kx, (N, C_in, L), dtype=jnp.float32)
    # Deterministic "init" of module params (synthetic, not a checkpoint load).
    w = jax.random.normal(kw, (C_out, C_in, K), dtype=jnp.float32) * 0.1
    gamma = 1.0 + 0.1 * jax.random.normal(kg, (C_out,), dtype=jnp.float32)
    beta = 0.1 * jax.random.normal(kb, (C_out,), dtype=jnp.float32)

    out = basic_conv1d(x, w, gamma, beta)
    jax.block_until_ready(out)

    assert out.shape == (N, C_out, L - K + 1)
    assert out.dtype == jnp.float32

    ref = _reference(x, w, gamma, beta)
    max_err = float(jnp.max(jnp.abs(out - ref)))
    assert jnp.allclose(out, ref, atol=1e-3, rtol=1e-3), max_err

    print("KERNEL_OK")
</pallas_src>

<mosaic_0001>
module attributes {stable_mosaic.version = 11 : i64} {
  func.func @conv_bn_relu_kernel(%arg0: memref<4x128xf32, #tpu.memory_space<vmem>>, %arg1: memref<8x12xf32, #tpu.memory_space<vmem>>, %arg2: memref<8x1xf32, #tpu.memory_space<vmem>>, %arg3: memref<8x1xf32, #tpu.memory_space<vmem>>, %arg4: memref<8x128xf32, #tpu.memory_space<vmem>>) attributes {dimension_semantics = [], scalar_prefetch = 0 : i64, scratch_operands = 0 : i64, tpu.core_type = #tpu.core_type<tc>} {
    %c0 = arith.constant 0 : index
    %c0_0 = arith.constant 0 : index
    %0 = vector.load %arg0[%c0, %c0_0] : memref<4x128xf32, #tpu.memory_space<vmem>>, vector<4x128xf32>
    %c127_i32 = arith.constant 127 : i32
    %1 = tpu.dynamic_rotate %0 by %c127_i32 dim 1 : vector<4x128xf32>, i32 -> vector<4x128xf32>
    %c126_i32 = arith.constant 126 : i32
    %2 = tpu.dynamic_rotate %0 by %c126_i32 dim 1 : vector<4x128xf32>, i32 -> vector<4x128xf32>
    %3 = tpu.concatenate %0, %1, %2 in 0 : vector<4x128xf32>, vector<4x128xf32>, vector<4x128xf32> -> vector<12x128xf32>
    %c0_1 = arith.constant 0 : index
    %c0_2 = arith.constant 0 : index
    %4 = vector.load %arg1[%c0_1, %c0_2] : memref<8x12xf32, #tpu.memory_space<vmem>>, vector<8x12xf32>
    %cst = arith.constant dense<0.000000e+00> : vector<8x128xf32>
    %5 = tpu.matmul %4, %3, %cst {dimension_numbers = #tpu.dot_dimension_numbers<[1], [0], [0], [1], [0, 0, 1, 1], [], []>} : vector<8x12xf32>, vector<12x128xf32>, vector<8x128xf32> -> vector<8x128xf32>
    %6 = tpu.iota {dimensions = array<i32: 1>} : vector<1x128xi32>
    %c32_i32 = arith.constant 32 : i32
    %7 = vector.broadcast %c32_i32 : i32 to vector<1x128xi32>
    %8 = arith.cmpi slt, %6, %7 : vector<1x128xi32>
    %c16_i32 = arith.constant 16 : i32
    %c0_i32 = arith.constant 0 : i32
    %9 = arith.cmpi eq, %c16_i32, %c0_i32 : i32
    %c1_i32 = arith.constant 1 : i32
    %10 = arith.select %9, %c1_i32, %c16_i32 : i32
    %11 = vector.broadcast %10 : i32 to vector<1x128xi32>
    %12 = arith.remsi %6, %11 : vector<1x128xi32>
    %c0_i32_3 = arith.constant 0 : i32
    %13 = vector.broadcast %c0_i32_3 : i32 to vector<1x128xi32>
    %14 = arith.cmpi ne, %12, %13 : vector<1x128xi32>
    %c0_i32_4 = arith.constant 0 : i32
    %15 = vector.broadcast %c0_i32_4 : i32 to vector<1x128xi32>
    %16 = arith.cmpi slt, %12, %15 : vector<1x128xi32>
    %c0_i32_5 = arith.constant 0 : i32
    %17 = arith.cmpi slt, %10, %c0_i32_5 : i32
    %18 = vector.broadcast %17 : i1 to vector<1x128xi1>
    %19 = vector.broadcast %18 : vector<1x128xi1> to vector<1x128xi1>
    %20 = arith.xori %16, %19 : vector<1x128xi1>
    %21 = arith.andi %20, %14 : vector<1x128xi1>
    %22 = vector.broadcast %10 : i32 to vector<1x128xi32>
    %23 = arith.addi %12, %22 : vector<1x128xi32>
    %24 = arith.select %21, %23, %12 : vector<1x128xi1>, vector<1x128xi32>
    %c14_i32 = arith.constant 14 : i32
    %25 = vector.broadcast %c14_i32 : i32 to vector<1x128xi32>
    %26 = arith.cmpi slt, %24, %25 : vector<1x128xi32>
    %27 = arith.andi %8, %26 : vector<1x128xi1>
    %cst_6 = arith.constant 0.000000e+00 : f32
    %28 = vector.shape_cast %27 : vector<1x128xi1> to vector<1x128xi1>
    %29 = vector.broadcast %28 : vector<1x128xi1> to vector<8x128xi1>
    %30 = vector.broadcast %cst_6 : f32 to vector<8x128xf32>
    %31 = arith.select %29, %5, %30 : vector<8x128xi1>, vector<8x128xf32>
    %cst_7 = arith.constant dense<0.000000e+00> : vector<8xf32>
    %32 = vector.multi_reduction <add>, %31, %cst_7 [1] : vector<8x128xf32> to vector<8xf32>
    %33 = vector.shape_cast %32 : vector<8xf32> to vector<8x1xf32>
    %cst_8 = arith.constant 0.0357142873 : f32
    %34 = vector.broadcast %cst_8 : f32 to vector<8x1xf32>
    %35 = arith.mulf %33, %34 : vector<8x1xf32>
    %36 = arith.mulf %31, %31 : vector<8x128xf32>
    %cst_9 = arith.constant dense<0.000000e+00> : vector<8xf32>
    %37 = vector.multi_reduction <add>, %36, %cst_9 [1] : vector<8x128xf32> to vector<8xf32>
    %38 = vector.shape_cast %37 : vector<8xf32> to vector<8x1xf32>
    %cst_10 = arith.constant 0.0357142873 : f32
    %39 = vector.broadcast %cst_10 : f32 to vector<8x1xf32>
    %40 = arith.mulf %38, %39 : vector<8x1xf32>
    %41 = arith.mulf %35, %35 : vector<8x1xf32>
    %42 = arith.subf %40, %41 : vector<8x1xf32>
    %cst_11 = arith.constant 0.000000e+00 : f32
    %43 = vector.broadcast %cst_11 : f32 to vector<8x1xf32>
    %44 = arith.maximumf %42, %43 : vector<8x1xf32>
    %c0_12 = arith.constant 0 : index
    %c0_13 = arith.constant 0 : index
    %45 = vector.load %arg2[%c0_12, %c0_13] : memref<8x1xf32, #tpu.memory_space<vmem>>, vector<8x1xf32>
    %cst_14 = arith.constant 1.000000e-03 : f32
    %46 = vector.broadcast %cst_14 : f32 to vector<8x1xf32>
    %47 = arith.addf %44, %46 : vector<8x1xf32>
    %48 = math.rsqrt %47 : vector<8x1xf32>
    %49 = arith.mulf %45, %48 : vector<8x1xf32>
    %c0_15 = arith.constant 0 : index
    %c0_16 = arith.constant 0 : index
    %50 = vector.load %arg3[%c0_15, %c0_16] : memref<8x1xf32, #tpu.memory_space<vmem>>, vector<8x1xf32>
    %51 = arith.mulf %35, %49 : vector<8x1xf32>
    %52 = arith.subf %50, %51 : vector<8x1xf32>
    %53 = vector.broadcast %49 : vector<8x1xf32> to vector<8x128xf32>
    %54 = arith.mulf %5, %53 : vector<8x128xf32>
    %55 = vector.broadcast %52 : vector<8x1xf32> to vector<8x128xf32>
    %56 = arith.addf %54, %55 : vector<8x128xf32>
    %cst_17 = arith.constant 0.000000e+00 : f32
    %57 = vector.broadcast %cst_17 : f32 to vector<8x128xf32>
    %58 = arith.maximumf %56, %57 : vector<8x128xf32>
    %c0_18 = arith.constant 0 : index
    %c0_19 = arith.constant 0 : index
    %59 = vector.load %arg4[%c0_18, %c0_19] : memref<8x128xf32, #tpu.memory_space<vmem>>, vector<8x128xf32>
    tpu.vector_store %arg4[%c0_18, %c0_19], %58 {strides = array<i32>} : memref<8x128xf32, #tpu.memory_space<vmem>>, vector<8x128xf32>,
    return
  }
}

</mosaic_0001>

<bundles_post_ra>
// kernel: tpu_custom_call.1
= control target key start
LH: loop header
LB: loop body
LE: loop exit
PB: predicated region body
PF: predicated region fallthrough
CT: control target
= control target key end

     0   :  { %s212_s0 = inlined_call_operand.vmem [shape: f32[4,128], index: 0, kind: input, shape index: {}]   ;;  %s213_s1 = inlined_call_operand.vmem [shape: f32[8,12], index: 1, kind: input, shape index: {}]   ;;  %s214_s2 = inlined_call_operand.vmem [shape: f32[8,1], index: 2, kind: input, shape index: {}]   ;;  %s215_s3 = inlined_call_operand.vmem [shape: f32[8,1], index: 3, kind: input, shape index: {}]   ;;  %s216_s4 = inlined_call_operand.hbm [shape: f32[8,128], index: 4, kind: output, shape index: {}]  }
   0x1   :  { %v18_v0 = vld [vmem:[%s212_s0] sm:$0xf] }
   0x2   :  { %9 = vsyncpa [#allocation3], 0  ;;  %s168_s17 = smov 127   ;;  %s169_s18 = smov 126   ;;  %vm26_vm0 = vcmask 1043456   ;;  %v28_v4 = vld [vmem:[%s213_s1] sm:$0xff]  ;;  %v56_v6 = vlaneseq }
   0x3   :  { %19 = vrot.lane.b32.xlu0 %v18_v0, %s168_s17  ;;  %vm29_vm1 = vcmask 97280   ;;  %v170_v12 = vmov 0   ;;  %v86_v26 = vld [vmem:[%s214_s2] sm:$0xff]  ;;  %s171_s23 = smov [#allocation2]   ;;  %s123_s26 = sshll.u32 %s216_s4, 4  ;;  %s124_s26 = int_to_ptr.hbm [resolvable:$true] %s123_s26 }
   0x4   :  { %v57_v7 = vand.u32 127, %v56_v6  ;;  %138 = vset.pattern.permute.xlu2 %v170_v12  ;;  %139 = vset.pattern.permute.xlu0 %v170_v12  ;;  %v99_v31 = vld [vmem:[%s215_s3] sm:$0xff]  ;;  %s121_s24 = sshll.u32 %s171_s23, 4  ;;  %s122_s24 = int_to_ptr.vmem [resolvable:$true] %s121_s24 }
   0x6   :  { %v63_v8 = vand.u32 15, %v57_v7  ;;  %vm58_vm2 = vcmp.lt.s32.totalorder %v57_v7, 32 }
   0x8   :  { %vm71_vm3 = vcmp.lt.s32.totalorder %v63_v8, 14 }
   0x9   :  { %vm72_vm4 = vmand %vm58_vm2, %vm71_vm3 }
   0xb   :  { %21 = vrot.lane.b32.xlu0 %v18_v0, %s169_s18 }
  0x75   :  { %v20_v1 = vpop.permute.xlu0 %19 }
  0x76   :  { %v24_v2 = vrot.slane %v20_v1, 4 }
  0x78   :  { %v27_v5 = vsel %vm26_vm0, %v18_v0, %v24_v2 }
  0x7d   :  { %v22_v3 = vpop.permute.xlu0 %21 }
  0x7e   :  { %132 = vmatpush.msk.msra.mxu0 %vm26_vm0, %v22_v3 }
  0x80   :  { %51 = vmatpush.msra.mxu0 %v27_v5 }
  0x81   :  { %133 = vmatmul.msk.f32.vlgmr.msra.gmra.mxu0 %vm29_vm1, %v28_v4 }
  0xfe   :  { %v53_v9 = vpop.f32.mrf.mxu0 }
  0xff   :  { %v75_v10 = vsel %vm72_vm4, %v53_v9, 0.0 }
 0x100   :  { %76 = vadd.xlane.f32.xlu1 %v75_v10  ;;  %v79_v11 = vmul.f32 %v75_v10, %v75_v10 }
 0x108   :  { %80 = vadd.xlane.f32.xlu1 %v79_v11 }
 0x173   :  { %v77_v13 = vpop.xlane.xlu1 %76 }
 0x174   :  { %v78_v14 = vmul.f32 0.035714287, %v77_v13 }
 0x176   :  { %v83_v16 = vmul.f32 %v78_v14, %v78_v14 }
 0x17b   :  { %v81_v15 = vpop.xlane.xlu1 %80 }
 0x17c   :  { %v82_v17 = vmul.f32 0.035714287, %v81_v15 }
 0x17e   :  { %v84_v18 = vsub.f32 %v82_v17, %v83_v16 }
 0x180   :  { %v85_v19 = vmax.f32 %v84_v18, 0.0 }
 0x182   :  { %v87_v20 = vadd.f32 0.001, %v85_v19 }
 0x184   :  { %140 = vrsqrt.f32 %v87_v20  ;;  %vm94_vm6 = vweird.f32 %v87_v20 }
 0x18a   :  { %v141_v21 = vpop.eup %140 }
 0x18b   :  { %v89_v22 = vmul.f32 %v141_v21, %v87_v20  ;;  %vm95_vm5 = vweird.f32 %v141_v21 }
 0x18c   :  { %vm96_vm7 = vmor %vm94_vm6, %vm95_vm5 }
 0x18d   :  { %v90_v23 = vmul.f32 %v141_v21, %v89_v22 }
 0x18f   :  { %v91_v24 = vmul.f32 0.5, %v90_v23 }
 0x191   :  { %v92_v25 = vsub.f32 1.5, %v91_v24 }
 0x193   :  { %v93_v27 = vmul.f32 %v141_v21, %v92_v25 }
 0x195   :  { %v97_v28 = vsel %vm96_vm7, %v141_v21, %v93_v27 }
 0x196   :  { %v98_v29 = vmul.f32 %v97_v28, %v86_v26 }
 0x198   :  { %104 = vperm.xlu2 %138, %v98_v29   ;;  %v100_v30 = vmul.f32 %v98_v29, %v78_v14 }
 0x19a   :  { %v101_v32 = vsub.f32 %v99_v31, %v100_v30 }
 0x1a0   :  { %110 = vperm.xlu2 %138, %v101_v32  }
 0x1f2   :  { %v105_v33 = vpop.permute.xlu2 %104 }
 0x1f3   :  { %v107_v34 = vmul.f32 %v105_v33, %v53_v9 }
 0x1fa   :  { %v111_v35 = vpop.permute.xlu2 %110 }
 0x1fb   :  { %v113_v36 = vadd.f32 %v111_v35, %v107_v34 }
 0x1fd   :  { %v114_v37 = vmax.f32 %v113_v36, 0.0 }
 0x1ff   :  { %115 = vst [vmem:[#allocation2] sm:$0xff] %v114_v37 }
 0x200   :  { %126 = dma.vmem_to_hbm [thread:$0]  %s122_s24, 128, %s124_s26, [#allocation3]  }
 0x201   :  { %166 = dma.done.wait [#allocation3], 128  }
 0x202   :  { %167 = vsyncadd [#allocation3], 4294967168 }
 0x203   :  { %131 = vsyncpa [#allocation3], 1 }

</bundles_post_ra>
